<compile_context>
chip_gen: v7x
topology: tpu7x:2x2x1
jax: 0.10.0
libtpu: 0.0.40
codegen_flags: <defaults>
</compile_context>

<pallas_src>
import jax
import jax.numpy as jnp
from jax.experimental import pallas as pl
from jax.experimental.pallas import tpu as pltpu


def _round_up(x, m):
    return (x + m - 1) // m * m


def _linear_kernel(x_ref, w_ref, b_ref, o_ref, acc_ref):
    # x_ref: (tm, tk) bf16, w_ref: (tk, OUT_pad) bf16, b_ref: (1, OUT_pad) f32
    # o_ref: (tm, OUT_pad) f32 out tile, acc_ref: (tm, OUT_pad) f32 scratch.
    k = pl.program_id(1)

    @pl.when(k == 0)
    def _():
        # Fold the bias into the accumulator init (drops a finalize add and
        # keeps the whole reduction in f32).
        acc_ref[...] = jnp.broadcast_to(b_ref[...], acc_ref.shape)

    acc_ref[...] += jnp.dot(
        x_ref[...], w_ref[...], preferred_element_type=jnp.float32
    )

    @pl.when(k == pl.num_programs(1) - 1)
    def _():
        o_ref[...] = acc_ref[...].astype(o_ref.dtype)


def cafenet_forward(x_nchw, w, b, *, compute_dtype=jnp.bfloat16):
    """Forward pass: flatten NCHW input and apply a single linear layer."""
    n = x_nchw.shape[0]
    x_flat = x_nchw.reshape(n, -1)            # (N, C*H*W)
    k_dim = x_flat.shape[1]
    out_dim = w.shape[1]
    out_dtype = x_flat.dtype

    # ---- pad to lane / sublane / MXU friendly tiles ------------------------
    out_pad = _round_up(out_dim, 128)         # lane-dense output stores
    tm = min(256, _round_up(n, 16))           # bf16 sublane packing (16 rows)
    tk = min(2048, _round_up(k_dim, 128))     # K tile; K axis is the reduction
    m_pad = _round_up(n, tm)
    k_pad = _round_up(k_dim, tk)

    xp = jnp.pad(x_flat, ((0, m_pad - n), (0, k_pad - k_dim))).astype(compute_dtype)
    wp = jnp.pad(w, ((0, k_pad - k_dim), (0, out_pad - out_dim))).astype(compute_dtype)
    bp = jnp.pad(b.astype(jnp.float32), (0, out_pad - out_dim)).reshape(1, out_pad)

    grid = (m_pad // tm, k_pad // tk)

    cost = pl.CostEstimate(
        flops=2 * m_pad * k_pad * out_pad,
        transcendentals=0,
        bytes_accessed=(
            xp.size * xp.dtype.itemsize
            + wp.size * wp.dtype.itemsize
            + bp.size * bp.dtype.itemsize
            + m_pad * out_pad * jnp.dtype(out_dtype).itemsize
        ),
    )

    out_padded = pl.pallas_call(
        _linear_kernel,
        out_shape=jax.ShapeDtypeStruct((m_pad, out_pad), out_dtype),
        grid_spec=pltpu.PrefetchScalarGridSpec(
            num_scalar_prefetch=0,
            grid=grid,
            in_specs=[
                pl.BlockSpec((tm, tk), lambda i, kk: (i, kk)),        # activations
                pl.BlockSpec((tk, out_pad), lambda i, kk: (kk, 0)),   # weights
                pl.BlockSpec((1, out_pad), lambda i, kk: (0, 0)),     # bias (resident)
            ],
            out_specs=pl.BlockSpec((tm, out_pad), lambda i, kk: (i, 0)),
            scratch_shapes=[pltpu.VMEM((tm, out_pad), jnp.float32)],
        ),
        compiler_params=pltpu.CompilerParams(
            dimension_semantics=("parallel", "arbitrary"),
            vmem_limit_bytes=32 * 1024 * 1024,   # safe on v5e/v6e/v7x
        ),
        cost_estimate=cost,
    )(xp, wp, bp)

    # Slice the zero-padding back off outside the kernel.
    return out_padded[:n, :out_dim]


if __name__ == "__main__":
    # Small, deterministic example shapes consistent with the module:
    # batch=2, channels=4, spatial=16x16  ->  in_features = 4*16*16 = 1024
    # num_classes (linear out) = 8
    N, C, H, W = 2, 4, 16, 16
    IN_FEATURES = C * H * W
    NUM_CLASSES = 8

    key = jax.random.PRNGKey(0)
    kx, kw, kb = jax.random.split(key, 3)

    x = jax.random.normal(kx, (N, C, H, W), dtype=jnp.float32)      # NCHW input
    w = jax.random.normal(kw, (IN_FEATURES, NUM_CLASSES), dtype=jnp.float32) * 0.02
    b = jax.random.normal(kb, (NUM_CLASSES,), dtype=jnp.float32) * 0.02

    out = cafenet_forward(x, w, b)
    out = jax.block_until_ready(out)

    # Reference 1: same bf16 operand cast, f32 accumulation (tight check).
    xb = x.reshape(N, -1).astype(jnp.bfloat16).astype(jnp.float32)
    wb = w.astype(jnp.bfloat16).astype(jnp.float32)
    ref_bf16 = xb @ wb + b
    # Reference 2: full f32 math (loose check — bf16 operand rounding only).
    ref_f32 = x.reshape(N, -1) @ w + b

    assert out.shape == (N, NUM_CLASSES)
    assert jnp.allclose(out, ref_bf16, atol=1e-3, rtol=1e-3)
    assert jnp.allclose(out, ref_f32, atol=5e-2, rtol=5e-2)

    print("KERNEL_OK")
</pallas_src>

<mosaic_0001>
module attributes {stable_mosaic.version = 11 : i64} {
  func.func @_linear_kernel(%arg0: i32, %arg1: i32, %arg2: memref<16x1024xbf16, #tpu.memory_space<vmem>>, %arg3: memref<1024x128xbf16, #tpu.memory_space<vmem>>, %arg4: memref<1x128xf32, #tpu.memory_space<vmem>>, %arg5: memref<16x128xf32, #tpu.memory_space<vmem>>, %arg6: memref<16x128xf32, #tpu.memory_space<vmem>>) attributes {dimension_semantics = [#tpu.dimension_semantics<parallel>, #tpu.dimension_semantics<arbitrary>], iteration_bounds = array<i64: 1, 1>, scalar_prefetch = 0 : i64, scratch_operands = 1 : i64, tpu.core_type = #tpu.core_type<tc>, window_params = [{transform_indices = @transform_0, window_bounds = array<i64: 16, 1024>}, {transform_indices = @transform_1, window_bounds = array<i64: 1024, 128>}, {pipeline_mode = #tpu.pipeline_mode<synchronous>, transform_indices = @transform_2, window_bounds = array<i64: 1, 128>}, {transform_indices = @transform_3, window_bounds = array<i64: 16, 128>}]} {
    %c0_i32 = arith.constant 0 : i32
    %0 = arith.cmpi eq, %arg1, %c0_i32 : i32
    %1 = arith.extui %0 : i1 to i32
    %c0_i32_0 = arith.constant 0 : i32
    %2 = arith.cmpi ne, %1, %c0_i32_0 : i32
    scf.if %2 {
      %c0_10 = arith.constant 0 : index
      %c0_11 = arith.constant 0 : index
      %12 = vector.load %arg4[%c0_10, %c0_11] : memref<1x128xf32, #tpu.memory_space<vmem>>, vector<1x128xf32>
      %13 = vector.shape_cast %12 : vector<1x128xf32> to vector<1x128xf32>
      %14 = vector.broadcast %13 : vector<1x128xf32> to vector<16x128xf32>
      %c0_12 = arith.constant 0 : index
      %c0_13 = arith.constant 0 : index
      %15 = vector.load %arg6[%c0_12, %c0_13] : memref<16x128xf32, #tpu.memory_space<vmem>>, vector<16x128xf32>
      tpu.vector_store %arg6[%c0_12, %c0_13], %14 {strides = array<i32>} : memref<16x128xf32, #tpu.memory_space<vmem>>, vector<16x128xf32>,
    } else {
    }
    %c0 = arith.constant 0 : index
    %c0_1 = arith.constant 0 : index
    %3 = vector.load %arg6[%c0, %c0_1] : memref<16x128xf32, #tpu.memory_space<vmem>>, vector<16x128xf32>
    %c0_2 = arith.constant 0 : index
    %c0_3 = arith.constant 0 : index
    %4 = vector.load %arg2[%c0_2, %c0_3] : memref<16x1024xbf16, #tpu.memory_space<vmem>>, vector<16x1024xbf16>
    %c0_4 = arith.constant 0 : index
    %c0_5 = arith.constant 0 : index
    %5 = vector.load %arg3[%c0_4, %c0_5] : memref<1024x128xbf16, #tpu.memory_space<vmem>>, vector<1024x128xbf16>
    %cst = arith.constant dense<0.000000e+00> : vector<16x128xf32>
    %6 = tpu.matmul %4, %5, %cst {dimension_numbers = #tpu.dot_dimension_numbers<[1], [0], [0], [1], [0, 0, 1, 1], [], []>} : vector<16x1024xbf16>, vector<1024x128xbf16>, vector<16x128xf32> -> vector<16x128xf32>
    %7 = arith.addf %3, %6 : vector<16x128xf32>
    %c0_6 = arith.constant 0 : index
    %c0_7 = arith.constant 0 : index
    %8 = vector.load %arg6[%c0_6, %c0_7] : memref<16x128xf32, #tpu.memory_space<vmem>>, vector<16x128xf32>
    tpu.vector_store %arg6[%c0_6, %c0_7], %7 {strides = array<i32>} : memref<16x128xf32, #tpu.memory_space<vmem>>, vector<16x128xf32>,
    %c0_i32_8 = arith.constant 0 : i32
    %9 = arith.cmpi eq, %arg1, %c0_i32_8 : i32
    %10 = arith.extui %9 : i1 to i32
    %c0_i32_9 = arith.constant 0 : i32
    %11 = arith.cmpi ne, %10, %c0_i32_9 : i32
    scf.if %11 {
      %c0_10 = arith.constant 0 : index
      %c0_11 = arith.constant 0 : index
      %12 = vector.load %arg6[%c0_10, %c0_11] : memref<16x128xf32, #tpu.memory_space<vmem>>, vector<16x128xf32>
      %c0_12 = arith.constant 0 : index
      %c0_13 = arith.constant 0 : index
      %13 = vector.load %arg5[%c0_12, %c0_13] : memref<16x128xf32, #tpu.memory_space<vmem>>, vector<16x128xf32>
      tpu.vector_store %arg5[%c0_12, %c0_13], %12 {strides = array<i32>} : memref<16x128xf32, #tpu.memory_space<vmem>>, vector<16x128xf32>,
    } else {
    }
    return
  }
  func.func @transform_0(%arg0: i32, %arg1: i32) -> (i32, i32) {
    %c0_i32 = arith.constant 0 : i32
    return %arg0, %arg1 : i32, i32
  }
  func.func @transform_1(%arg0: i32, %arg1: i32) -> (i32, i32) {
    %c0_i32 = arith.constant 0 : i32
    %c0_i32_0 = arith.constant 0 : i32
    return %arg1, %c0_i32 : i32, i32
  }
  func.func @transform_2(%arg0: i32, %arg1: i32) -> (i32, i32) {
    %c0_i32 = arith.constant 0 : i32
    %c0_i32_0 = arith.constant 0 : i32
    %c0_i32_1 = arith.constant 0 : i32
    return %c0_i32, %c0_i32_0 : i32, i32
  }
  func.func @transform_3(%arg0: i32, %arg1: i32) -> (i32, i32) {
    %c0_i32 = arith.constant 0 : i32
    %c0_i32_0 = arith.constant 0 : i32
    return %arg0, %c0_i32 : i32, i32
  }
}

</mosaic_0001>

<bundles_post_ra>
// kernel: tpu_custom_call.1
= control target key start
LH: loop header
LB: loop body
LE: loop exit
PB: predicated region body
PF: predicated region fallthrough
CT: control target
= control target key end

     0   :  { %8 = vsyncpa [#allocation4], 0  ;;  %s1186_s0 = inlined_call_operand.hbm [shape: bf16[16,1024], index: 0, kind: input, shape index: {}]   ;;  %s1187_s1 = inlined_call_operand.hbm [shape: bf16[1024,128], index: 1, kind: input, shape index: {}]   ;;  %s1188_s2 = inlined_call_operand.vmem [shape: f32[1,128], index: 2, kind: input, shape index: {}]   ;;  %s1189_s3 = inlined_call_operand.hbm [shape: f32[16,128], index: 3, kind: output, shape index: {}]  }
   0x1   :  { %9 = vsyncpa [#allocation7], 0 }
   0x2   :  { %10 = vsyncpa [#allocation5], 0  ;;  %s1118_s12 = smov [#allocation3]   ;;  %s1046_s16 = scalar_lea.hbm %s1186_s0, 1024 }
   0x3   :  { %s16_s13 = sshll.u32 %s1118_s12, 4  ;;  %p1047_p0 = scmp.ne.s32.totalorder %s1186_s0, %s1046_s16  ;;  %s17_s13 = int_to_ptr.vmem [resolvable:$true] %s16_s13 }
   0x4   :  { %p1050_p1 = scmp.lt.u32.totalorder %s1046_s16, %s1186_s0 }
   0x6   :  { %p1052_p2 = pnand %p1050_p1, %p1047_p0 }
   0x8   :  { %1055 = shalt.err (!%p1052_p2)
}
   0x9   :  { %s1056_s21 = scalar_lea.vmem %s17_s13, 1024  ;;  %p1061_p4 = scmp.lt.s32.totalorder %s17_s13, %s17_s13 }
   0xa   :  { %p1057_p3 = scmp.ne.s32.totalorder %s17_s13, %s1056_s21  ;;  %p1062_p5 = scmp.lt.s32.totalorder %s1056_s21, %s1056_s21 }
   0xc   :  { %p1063_p6 = por %p1062_p5, %p1061_p4 }
   0xe   :  { %p1064_p7 = pnand %p1063_p6, %p1057_p3 }
  0x10   :  { %1067 = shalt.err (!%p1064_p7)
}
  0x11   :  { %s1119_s22 = smov 512   ;;  %s1120_s23 = smov 32  }
  0x12   :  { %22 = dma.hbm_to_vmem [thread:$0]  %s1186_s0, 1024, %s17_s13, [#allocation4], %s1119_s22, %s1119_s22, %s1120_s23  }
  0x13   :  { %s1121_s26 = smov [#allocation6]   ;;  %s1068_s30 = scalar_lea.hbm %s1187_s1, 8192 }
  0x14   :  { %s28_s27 = sshll.u32 %s1121_s26, 4  ;;  %p1069_p8 = scmp.ne.s32.totalorder %s1187_s1, %s1068_s30  ;;  %s29_s27 = int_to_ptr.vmem [resolvable:$true] %s28_s27 }
  0x15   :  { %p1072_p9 = scmp.lt.u32.totalorder %s1068_s30, %s1187_s1 }
  0x17   :  { %p1074_p10 = pnand %p1072_p9, %p1069_p8 }
  0x19   :  { %1077 = shalt.err (!%p1074_p10)
}
  0x1a   :  { %s1078_s8 = scalar_lea.vmem %s29_s27, 8192  ;;  %p1083_p12 = scmp.lt.s32.totalorder %s29_s27, %s29_s27 }
  0x1b   :  { %p1079_p11 = scmp.ne.s32.totalorder %s29_s27, %s1078_s8  ;;  %p1084_p13 = scmp.lt.s32.totalorder %s1078_s8, %s1078_s8 }
  0x1d   :  { %p1085_p0 = por %p1084_p13, %p1083_p12 }
  0x1f   :  { %p1086_p1 = pnand %p1085_p0, %p1079_p11 }
  0x21   :  { %1089 = shalt.err (!%p1086_p1)
}
  0x22   :  { %s1122_s0 = smov 64   ;;  %s1123_s9 = smov 4  }
  0x23   :  { %34 = dma.hbm_to_vmem [thread:$0]  %s1187_s1, 8192, %s29_s27, [#allocation7], %s1122_s0, %s1122_s0, %s1123_s9  }
  0x24   :  { %1112 = dma.done.wait [#allocation4], 1024  }
  0x25   :  { %1113 = vsyncadd [#allocation4], 4294966272 }
  0x26   :  { %1114 = dma.done.wait [#allocation7], 8192  }
  0x27   :  { %1115 = vsyncadd [#allocation7], 4294959104  ;;  %v982_v0 = vld [vmem:[#allocation6 + $0x40] sm:$0xff]   ;;  %v986_v4 = vld [vmem:[#allocation6 + $0x48] sm:$0xff]   ;;  %s1124_s13 = smov [#allocation8]  }
  0x28   :  { %v983_v1 = vld [vmem:[#allocation6 + $0xc0] sm:$0xff]   ;;  %885 = vmatprep.subr.bf16.mxu0 %v982_v0  ;;  %v987_v5 = vld [vmem:[#allocation6 + $0xc8] sm:$0xff]   ;;  %v990_v8 = vld [vmem:[#allocation6 + $0x50] sm:$0xff]   ;;  %s799_s14 = sshll.u32 %s1124_s13, 4  ;;  %s800_s14 = int_to_ptr.vmem [resolvable:$true] %s799_s14 }
  0x29   :  { %v984_v2 = vld [vmem:[#allocation6] sm:$0xff]   ;;  %907 = vmatprep.subr.bf16.mxu1 %v983_v1  ;;  %v988_v6 = vld [vmem:[#allocation6 + $0x8] sm:$0xff]   ;;  %v991_v9 = vld [vmem:[#allocation6 + $0xd0] sm:$0xff]   ;;  %s1090_s15 = scalar_lea.vmem %s800_s14, 256  ;;  %p1095_p3 = scmp.lt.s32.totalorder %s800_s14, %s800_s14 }
  0x2a   :  { %v985_v3 = vld [vmem:[#allocation6 + $0x80] sm:$0xff]   ;;  %886 = vmatpush3.bf16.msra.mxu0 %v984_v2  ;;  %v989_v7 = vld [vmem:[#allocation6 + $0x88] sm:$0xff]   ;;  %v992_v10 = vld [vmem:[#allocation6 + $0x10] sm:$0xff]   ;;  %p1091_p2 = scmp.ne.s32.totalorder %s800_s14, %s1090_s15  ;;  %p1096_p4 = scmp.lt.s32.totalorder %s1090_s15, %s1090_s15 }
  0x2b   :  { %908 = vmatpush3.bf16.msra.mxu1 %v985_v3  ;;  %887 = vmatprep.subr.bf16.mxu0 %v986_v4  ;;  %v993_v11 = vld [vmem:[#allocation6 + $0x90] sm:$0xff]   ;;  %v994_v12 = vld [vmem:[#allocation6 + $0x58] sm:$0xff]   ;;  %v998_v16 = vld [vmem:[#allocation6 + $0x60] sm:$0xff]  }
  0x2c   :  { %909 = vmatprep.subr.bf16.mxu1 %v987_v5  ;;  %v995_v13 = vld [vmem:[#allocation6 + $0xd8] sm:$0xff]   ;;  %v999_v17 = vld [vmem:[#allocation6 + $0xe0] sm:$0xff]   ;;  %v1002_v20 = vld [vmem:[#allocation6 + $0x68] sm:$0xff]   ;;  %p1097_p5 = por %p1096_p4, %p1095_p3 }
  0x2d   :  { %v996_v14 = vld [vmem:[#allocation6 + $0x18] sm:$0xff]   ;;  %v1000_v18 = vld [vmem:[#allocation6 + $0x20] sm:$0xff]   ;;  %v1003_v21 = vld [vmem:[#allocation6 + $0xe8] sm:$0xff]  }
  0x2e   :  { %888 = vmatpush3.bf16.msra.mxu0 %v988_v6  ;;  %v997_v15 = vld [vmem:[#allocation6 + $0x98] sm:$0xff]   ;;  %v1001_v19 = vld [vmem:[#allocation6 + $0xa0] sm:$0xff]   ;;  %v1004_v22 = vld [vmem:[#allocation6 + $0x28] sm:$0xff]   ;;  %p1098_p6 = pnand %p1097_p5, %p1091_p2 }
  0x2f   :  { %910 = vmatpush3.bf16.msra.mxu1 %v989_v7  ;;  %889 = vmatprep.subr.bf16.mxu0 %v990_v8  ;;  %v1005_v23 = vld [vmem:[#allocation6 + $0xa8] sm:$0xff]   ;;  %v1006_v24 = vld [vmem:[#allocation6 + $0x70] sm:$0xff]   ;;  %v1010_v28 = vld [vmem:[#allocation6 + $0x78] sm:$0xff]  }
  0x30   :  { %911 = vmatprep.subr.bf16.mxu1 %v991_v9  ;;  %v1007_v25 = vld [vmem:[#allocation6 + $0xf0] sm:$0xff]   ;;  %v1011_v29 = vld [vmem:[#allocation6 + $0xf8] sm:$0xff]   ;;  %v59_v32 = vld [vmem:[#allocation3] sm:$0xff] }
  0x31   :  { %v1008_v26 = vld [vmem:[#allocation6 + $0x30] sm:$0xff]   ;;  %v1012_v30 = vld [vmem:[#allocation6 + $0x38] sm:$0xff]   ;;  %v63_v33 = vld [vmem:[#allocation3 + $0x20] sm:$0xff] }
  0x32   :  { %890 = vmatpush3.bf16.msra.mxu0 %v992_v10  ;;  %v1009_v27 = vld [vmem:[#allocation6 + $0xb0] sm:$0xff]   ;;  %v1013_v31 = vld [vmem:[#allocation6 + $0xb8] sm:$0xff]   ;;  %v60_v34 = vld [vmem:[#allocation3 + $0x8] sm:$0xff]  ;;  %v813_v35 = vcombine.low %v59_v32, %v63_v33  ;;  %v814_v36 = vcombine.high %v59_v32, %v63_v33 }
  0x33   :  { %912 = vmatpush3.bf16.msra.mxu1 %v993_v11  ;;  %891 = vmatprep.subr.bf16.mxu0 %v994_v12  ;;  %v64_v37 = vld [vmem:[#allocation3 + $0x28] sm:$0xff]  ;;  %v1014_v40 = vld [vmem:[#allocation6 + $0x140] sm:$0xff]   ;;  %v1022_v48 = vld [vmem:[#allocation6 + $0x150] sm:$0xff]  }
  0x34   :  { %913 = vmatprep.subr.bf16.mxu1 %v995_v13  ;;  %v815_v38 = vcombine.low %v60_v34, %v64_v37  ;;  %v816_v39 = vcombine.high %v60_v34, %v64_v37  ;;  %651 = vmatprep.mubr.bf16.mxu0 %v814_v36  ;;  %v1015_v41 = vld [vmem:[#allocation6 + $0x1c0] sm:$0xff]   ;;  %v1018_v44 = vld [vmem:[#allocation6 + $0x148] sm:$0xff]   ;;  %v1023_v49 = vld [vmem:[#allocation6 + $0x1d0] sm:$0xff]  }
  0x35   :  { %v1016_v42 = vld [vmem:[#allocation6 + $0x100] sm:$0xff]   ;;  %v1019_v45 = vld [vmem:[#allocation6 + $0x1c8] sm:$0xff]   ;;  %v1024_v50 = vld [vmem:[#allocation6 + $0x110] sm:$0xff]  }
  0x36   :  { %892 = vmatpush3.bf16.msra.mxu0 %v996_v14  ;;  %692 = vmatprep.mubr.bf16.mxu1 %v816_v39  ;;  %v1017_v43 = vld [vmem:[#allocation6 + $0x180] sm:$0xff]   ;;  %v1020_v46 = vld [vmem:[#allocation6 + $0x108] sm:$0xff]   ;;  %v1025_v51 = vld [vmem:[#allocation6 + $0x190] sm:$0xff]  }
  0x37   :  { %914 = vmatpush3.bf16.msra.mxu1 %v997_v15  ;;  %893 = vmatprep.subr.bf16.mxu0 %v998_v16  ;;  %v1021_v47 = vld [vmem:[#allocation6 + $0x188] sm:$0xff]   ;;  %v1026_v52 = vld [vmem:[#allocation6 + $0x158] sm:$0xff]   ;;  %v1030_v56 = vld [vmem:[#allocation6 + $0x160] sm:$0xff]  }
  0x38   :  { %915 = vmatprep.subr.bf16.mxu1 %v999_v17  ;;  %v1027_v53 = vld [vmem:[#allocation6 + $0x1d8] sm:$0xff]   ;;  %v1031_v57 = vld [vmem:[#allocation6 + $0x1e0] sm:$0xff]   ;;  %v1034_v60 = vld [vmem:[#allocation6 + $0x168] sm:$0xff]  }
  0x39   :  { %v1028_v54 = vld [vmem:[#allocation6 + $0x118] sm:$0xff]   ;;  %v1032_v58 = vld [vmem:[#allocation6 + $0x120] sm:$0xff]   ;;  %v1035_v61 = vld [vmem:[#allocation6 + $0x1e8] sm:$0xff]  }
  0x3a   :  { %894 = vmatpush3.bf16.msra.mxu0 %v1000_v18  ;;  %v1029_v55 = vld [vmem:[#allocation6 + $0x198] sm:$0xff]   ;;  %v1033_v59 = vld [vmem:[#allocation6 + $0x1a0] sm:$0xff]   ;;  %v1036_v62 = vld [vmem:[#allocation6 + $0x128] sm:$0xff]  }
  0x3b   :  { %916 = vmatpush3.bf16.msra.mxu1 %v1001_v19  ;;  %895 = vmatprep.subr.bf16.mxu0 %v1002_v20  ;;  %v1037_v63 = vld [vmem:[#allocation6 + $0x1a8] sm:$0xff]   ;;  %v1038_v0 = vld [vmem:[#allocation6 + $0x170] sm:$0xff]   ;;  %v1042_v4 = vld [vmem:[#allocation6 + $0x178] sm:$0xff]  }
  0x3c   :  { %917 = vmatprep.subr.bf16.mxu1 %v1003_v21  ;;  %v1039_v1 = vld [vmem:[#allocation6 + $0x1f0] sm:$0xff]   ;;  %v1043_v5 = vld [vmem:[#allocation6 + $0x1f8] sm:$0xff]  }
  0x3d   :  { %v1040_v2 = vld [vmem:[#allocation6 + $0x130] sm:$0xff]   ;;  %v1044_v6 = vld [vmem:[#allocation6 + $0x138] sm:$0xff]  }
  0x3e   :  { %896 = vmatpush3.bf16.msra.mxu0 %v1004_v22  ;;  %v1041_v3 = vld [vmem:[#allocation6 + $0x1b0] sm:$0xff]   ;;  %v1045_v7 = vld [vmem:[#allocation6 + $0x1b8] sm:$0xff]  }
  0x3f   :  { %918 = vmatpush3.bf16.msra.mxu1 %v1005_v23  ;;  %897 = vmatprep.subr.bf16.mxu0 %v1006_v24  ;;  %v61_v8 = vld [vmem:[#allocation3 + $0x10] sm:$0xff]  ;;  %v62_v12 = vld [vmem:[#allocation3 + $0x18] sm:$0xff] }
  0x40   :  { %919 = vmatprep.subr.bf16.mxu1 %v1007_v25  ;;  %v65_v9 = vld [vmem:[#allocation3 + $0x30] sm:$0xff]  ;;  %v66_v13 = vld [vmem:[#allocation3 + $0x38] sm:$0xff] }
  0x41   :  { %v817_v10 = vcombine.low %v61_v8, %v65_v9  ;;  %v818_v11 = vcombine.high %v61_v8, %v65_v9  ;;  %v819_v14 = vcombine.low %v62_v12, %v66_v13  ;;  %v820_v15 = vcombine.high %v62_v12, %v66_v13 }
  0x42   :  { %898 = vmatpush3.bf16.msra.mxu0 %v1008_v26 }
  0x43   :  { %920 = vmatpush3.bf16.msra.mxu1 %v1009_v27  ;;  %899 = vmatprep.subr.bf16.mxu0 %v1010_v28 }
  0x44   :  { %921 = vmatprep.subr.bf16.mxu1 %v1011_v29 }
  0x46   :  { %900 = vmatpush3.bf16.msra.mxu0 %v1012_v30 }
  0x47   :  { %922 = vmatpush3.bf16.msra.mxu1 %v1013_v31  ;;  %929 = vmatprep.subr.bf16.mxu0 %v1014_v40 }
  0x48   :  { %951 = vmatprep.subr.bf16.mxu1 %v1015_v41 }
  0x49   :  { %652 = vmatmul.mubr.bf16.vlgmr.msra.gmra.mrb[0].mxu0 %v813_v35 }
  0x4a   :  { %693 = vmatmul.mubr.bf16.vlgmr.msra.gmra.mrb[0].mxu1 %v815_v38  ;;  %930 = vmatpush3.bf16.msra.mxu0 %v1016_v42  ;;  %v812_v42 = vld [vmem:[%s1188_s2] ss:$0 sm:$0xff] }
  0x4b   :  { %952 = vmatpush3.bf16.msra.mxu1 %v1017_v43  ;;  %931 = vmatprep.subr.bf16.mxu0 %v1018_v44 }
  0x4c   :  { %953 = vmatprep.subr.bf16.mxu1 %v1019_v45  ;;  %733 = vmatprep.mubr.bf16.mxu0 %v818_v11 }
  0x4d   :  { %774 = vmatprep.mubr.bf16.mxu1 %v820_v15 }
  0x4e   :  { %932 = vmatpush3.bf16.msra.mxu0 %v1020_v46 }
  0x4f   :  { %954 = vmatpush3.bf16.msra.mxu1 %v1021_v47  ;;  %933 = vmatprep.subr.bf16.mxu0 %v1022_v48 }
  0x50   :  { %955 = vmatprep.subr.bf16.mxu1 %v1023_v49 }
  0x52   :  { %934 = vmatpush3.bf16.msra.mxu0 %v1024_v50 }
  0x53   :  { %956 = vmatpush3.bf16.msra.mxu1 %v1025_v51  ;;  %935 = vmatprep.subr.bf16.mxu0 %v1026_v52 }
  0x54   :  { %957 = vmatprep.subr.bf16.mxu1 %v1027_v53 }
  0x56   :  { %936 = vmatpush3.bf16.msra.mxu0 %v1028_v54 }
  0x57   :  { %958 = vmatpush3.bf16.msra.mxu1 %v1029_v55  ;;  %937 = vmatprep.subr.bf16.mxu0 %v1030_v56 }
  0x58   :  { %959 = vmatprep.subr.bf16.mxu1 %v1031_v57 }
  0x5a   :  { %938 = vmatpush3.bf16.msra.mxu0 %v1032_v58 }
  0x5b   :  { %960 = vmatpush3.bf16.msra.mxu1 %v1033_v59  ;;  %939 = vmatprep.subr.bf16.mxu0 %v1034_v60 }
  0x5c   :  { %961 = vmatprep.subr.bf16.mxu1 %v1035_v61 }
  0x5e   :  { %940 = vmatpush3.bf16.msra.mxu0 %v1036_v62 }
  0x5f   :  { %962 = vmatpush3.bf16.msra.mxu1 %v1037_v63  ;;  %941 = vmatprep.subr.bf16.mxu0 %v1038_v0 }
  0x60   :  { %963 = vmatprep.subr.bf16.mxu1 %v1039_v1 }
  0x62   :  { %942 = vmatpush3.bf16.msra.mxu0 %v1040_v2 }
  0x63   :  { %964 = vmatpush3.bf16.msra.mxu1 %v1041_v3  ;;  %943 = vmatprep.subr.bf16.mxu0 %v1042_v4 }
  0x64   :  { %965 = vmatprep.subr.bf16.mxu1 %v1043_v5 }
  0x66   :  { %944 = vmatpush3.bf16.msra.mxu0 %v1044_v6 }
  0x67   :  { %966 = vmatpush3.bf16.msra.mxu1 %v1045_v7 }
  0x69   :  { %734 = vmatmul.mubr.bf16.vlgmr.msra.gmra.mrb[4].mxu0 %v817_v10 }
  0x6a   :  { %775 = vmatmul.mubr.bf16.vlgmr.msra.gmra.mrb[4].mxu1 %v819_v14 }
 0x11c   :  { %v901_v16 = vpop.f32.mrb[0].mxu0 }
 0x11d   :  { %v923_v17 = vpop.f32.mrb[0].mxu1  ;;  %v902_v18 = vpop.f32.mrb[1].mxu0 }
 0x11e   :  { %v903_v19 = vadd.f32 %v902_v18, %v901_v16  ;;  %v924_v20 = vpop.f32.mrb[1].mxu1  ;;  %v904_v21 = vpop.f32.mrb[2].mxu0 }
 0x11f   :  { %v925_v22 = vadd.f32 %v924_v20, %v923_v17  ;;  %v926_v23 = vpop.f32.mrb[2].mxu1  ;;  %v905_v24 = vpop.f32.mrb[3].mxu0 }
 0x120   :  { %v906_v25 = vadd.f32 %v905_v24, %v904_v21  ;;  %v927_v26 = vpop.f32.mrb[3].mxu1 }
 0x121   :  { %v695_v27 = vadd.f32 %v925_v22, %v903_v19  ;;  %v928_v28 = vadd.f32 %v927_v26, %v926_v23 }
 0x123   :  { %v698_v29 = vadd.f32 %v928_v28, %v906_v25 }
 0x13c   :  { %v945_v30 = vpop.f32.mrb[4].mxu0 }
 0x13d   :  { %v967_v31 = vpop.f32.mrb[4].mxu1  ;;  %v946_v32 = vpop.f32.mrb[5].mxu0 }
 0x13e   :  { %v947_v33 = vadd.f32 %v946_v32, %v945_v30  ;;  %v968_v34 = vpop.f32.mrb[5].mxu1  ;;  %v948_v35 = vpop.f32.mrb[6].mxu0 }
 0x13f   :  { %v969_v36 = vadd.f32 %v968_v34, %v967_v31  ;;  %v970_v37 = vpop.f32.mrb[6].mxu1  ;;  %v949_v38 = vpop.f32.mrb[7].mxu0 }
 0x140   :  { %v736_v39 = vadd.f32 %v947_v33, %v695_v27  ;;  %v950_v40 = vadd.f32 %v949_v38, %v948_v35  ;;  %v971_v41 = vpop.f32.mrb[7].mxu1 }
 0x141   :  { %v972_v43 = vadd.f32 %v971_v41, %v970_v37 }
 0x142   :  { %v777_v44 = vadd.f32 %v969_v36, %v736_v39  ;;  %v739_v45 = vadd.f32 %v950_v40, %v698_v29 }
 0x144   :  { %v783_v46 = vadd.f32 %v812_v42, %v777_v44  ;;  %v780_v47 = vadd.f32 %v972_v43, %v739_v45 }
 0x146   :  { %792 = vst [vmem:[#allocation8] sm:$0xff] %v783_v46  ;;  %v784_v48 = vadd.f32 %v812_v42, %v780_v47 }
 0x148   :  { %793 = vst [vmem:[#allocation8 + $0x8] sm:$0xff] %v784_v48 }
 0x149   :  { %1101 = shalt.err (!%p1098_p6)
}
 0x14a   :  { %s1102_s17 = scalar_lea.hbm %s1189_s3, 256 }
 0x14b   :  { %p1103_p7 = scmp.ne.s32.totalorder %s1189_s3, %s1102_s17  ;;  %p1106_p8 = scmp.lt.u32.totalorder %s1102_s17, %s1189_s3 }
 0x14d   :  { %p1108_p9 = pnand %p1106_p8, %p1103_p7 }
 0x14f   :  { %1111 = shalt.err (!%p1108_p9)
}
 0x150   :  { %s1125_s22 = smov 128   ;;  %s1126_s23 = smov 8  }
 0x151   :  { %805 = dma.vmem_to_hbm [thread:$0]  %s800_s14, 256, %s1189_s3, [#allocation5], %s1125_s22, %s1125_s22, %s1126_s23  }
 0x152   :  { %1116 = dma.done.wait [#allocation5], 256  }
 0x153   :  { %1117 = vsyncadd [#allocation5], 4294967040 }
 0x154   :  { %809 = vsyncpa [#allocation4], 1 }
 0x155   :  { %810 = vsyncpa [#allocation7], 1 }
 0x156   :  { %811 = vsyncpa [#allocation5], 1 }

</bundles_post_ra>
